<compile_context>
chip_gen: v6e
topology: v6e:2x2x1
jax: 0.10.0
libtpu: 0.0.40
codegen_flags: <defaults>
</compile_context>

<pallas_src>
import functools
import math

import jax
import jax.numpy as jnp
from jax.experimental import pallas as pl
from jax.experimental.pallas import tpu as pltpu


# ---------------------------------------------------------------------------
# Small math helpers
# ---------------------------------------------------------------------------
_ERF_P = 0.3275911
_ERF_A = (0.254829592, -0.284496736, 1.421413741, -1.453152027, 1.061405429)


def _erf(x):
    # Abramowitz & Stegun 7.1.26 polynomial approximation of erf (|err| < 1.5e-7).
    ax = jnp.abs(x)
    t = 1.0 / (1.0 + _ERF_P * ax)
    poly = t * (_ERF_A[0] + t * (_ERF_A[1] + t * (_ERF_A[2] + t * (_ERF_A[3] + t * _ERF_A[4]))))
    y = 1.0 - poly * jnp.exp(-(ax * ax))
    return jnp.where(x < 0.0, -y, y)


def _gelu(x):
    # erf-form gelu, matching the PyTorch reference (kept in f32)
    return x * 0.5 * (1.0 + _erf(x * (1.0 / math.sqrt(2.0))))


def _round_up(x, m):
    return (x + m - 1) // m * m


def _vocab_tiling(vocab_size, max_tile=2048):
    lane = 128
    if vocab_size <= max_tile:
        v_pad = _round_up(vocab_size, lane)
        return v_pad, v_pad          # one tile covering the (padded) vocab
    v_pad = _round_up(vocab_size, max_tile)
    return max_tile, v_pad


def _pick_batch_tile(batch, seq):
    # smallest batch tile whose row count is sublane (8) aligned; fall back to the whole batch
    for bt in range(1, batch + 1):
        if batch % bt == 0 and (bt * seq) % 8 == 0:
            return bt
    return batch


# ---------------------------------------------------------------------------
# Kernels
# ---------------------------------------------------------------------------
def encoder_stack_kernel(x_ref, bias_ref, gamma_ref, beta_ref,
                         wqkv_ref, bqkv_ref, wo_ref, bo_ref,
                         w1_ref, b1_ref, w2_ref, b2_ref,
                         out_ref, *, n_heads, d_k, eps, batch, seq):
    layer = pl.program_id(1)
    HD = n_heads * d_k

    # Fused embedding LayerNorm on the first layer iteration.  The normalized activations live in
    # the VMEM-resident output block, which is the layer-to-layer carry (constant output index_map
    # over the layer axis => written back to HBM only once per batch tile).
    @pl.when(layer == 0)
    def _():
        x0 = x_ref[...]                                          # [BT*S, D] f32
        mu = jnp.mean(x0, axis=-1, keepdims=True)
        var = jnp.mean((x0 - mu) ** 2, axis=-1, keepdims=True)
        out_ref[...] = (x0 - mu) * jax.lax.rsqrt(var + eps) * gamma_ref[...] + beta_ref[...]

    x = out_ref[...]                                             # [BT*S, D] f32 carry
    x_bf = x.astype(jnp.bfloat16)

    # Fused QKV projection (1/sqrt(d_k) already folded into the Q columns at prep time).
    qkv = jnp.dot(x_bf, wqkv_ref[0], preferred_element_type=jnp.float32) + bqkv_ref[0]
    qkv3 = qkv.reshape(batch, seq, 3 * HD)                       # [BT, S, 3*HD]

    # Split heads ONCE (lane -> major relayout), then run the whole attention as batched rank-3
    # einsums over the merged (head * batch) axis -> a single MXU stream, bounded live ranges.
    def split_heads(off):
        return jnp.concatenate(
            [qkv3[:, :, off + h * d_k: off + (h + 1) * d_k] for h in range(n_heads)],
            axis=0)                                              # [H*BT, S, d_k]

    q = split_heads(0).astype(jnp.bfloat16)
    k = split_heads(HD).astype(jnp.bfloat16)
    v = split_heads(2 * HD).astype(jnp.bfloat16)

    s = jnp.einsum('nqd,nkd->nqk', q, k,
                   preferred_element_type=jnp.float32)           # [H*BT, S, S] f32
    # additive pad bias (precomputed as pad * -1e9 in the wrapper); broadcasts over heads/queries
    s = s.reshape(n_heads, batch, seq, seq) + bias_ref[...]      # bias_ref: [BT, 1, S]
    s = s - jnp.max(s, axis=-1, keepdims=True)
    p = jnp.exp(s)                                               # f32 softmax statistics
    p = p * pl.reciprocal(jnp.sum(p, axis=-1, keepdims=True), approx=True)
    p = p.reshape(n_heads * batch, seq, seq).astype(jnp.bfloat16)

    ctx = jnp.einsum('nqk,nkd->nqd', p, v,
                     preferred_element_type=jnp.float32)         # [H*BT, S, d_k]

    # merge heads back into lanes and run ONE K=HD output projection
    ctx_cat = jnp.concatenate(
        [ctx[h * batch:(h + 1) * batch] for h in range(n_heads)], axis=-1)   # [BT, S, HD]
    ctx2 = ctx_cat.reshape(batch * seq, HD).astype(jnp.bfloat16)
    attn = jnp.dot(ctx2, wo_ref[0], preferred_element_type=jnp.float32) + bo_ref[0]

    # position-wise feed-forward: fc2(gelu(fc1(x)))  (no residual / LN, per the reference)
    h1 = jnp.dot(attn.astype(jnp.bfloat16), w1_ref[0],
                 preferred_element_type=jnp.float32) + b1_ref[0]
    g = _gelu(h1)                                                # f32 elementwise
    y = jnp.dot(g.astype(jnp.bfloat16), w2_ref[0],
                preferred_element_type=jnp.float32) + b2_ref[0]
    out_ref[...] = y


def pooler_heads_kernel(cls_ref, hm_ref, wp_ref, bp_ref, wc_ref, bc_ref, wl_ref, bl_ref,
                        clsf_ref, g_ref):
    # pooler + classifier (Dropout is identity at inference); classifier width padded to 128 lanes
    pooled = jnp.tanh(jnp.dot(cls_ref[...].astype(jnp.bfloat16), wp_ref[...],
                              preferred_element_type=jnp.float32) + bp_ref[...])
    clsf_ref[...] = jnp.dot(pooled.astype(jnp.bfloat16), wc_ref[...],
                            preferred_element_type=jnp.float32) + bc_ref[...]
    # masked-LM hidden: gelu(linear(h_masked))  (tied-weight logits done in a vocab-tiled kernel)
    z = jnp.dot(hm_ref[...].astype(jnp.bfloat16), wl_ref[...],
                preferred_element_type=jnp.float32) + bl_ref[...]
    g_ref[...] = _gelu(z)


def lm_logits_kernel(g_ref, embT_ref, lm_ref):
    # one vocab tile of the tied-weight LM logits: [BP, D] @ [D, TILE_V]
    lm_ref[...] = jnp.dot(g_ref[...].astype(jnp.bfloat16), embT_ref[...],
                          preferred_element_type=jnp.float32)


# ---------------------------------------------------------------------------
# Pallas wrappers
# ---------------------------------------------------------------------------
def encoder_stack(x2, mask_bias, p, *, n_heads, d_k, eps=1e-5):
    BS, D = x2.shape
    B = mask_bias.shape[0]
    S = BS // B
    L = p['wqkv'].shape[0]
    HD = n_heads * d_k
    F = p['w1'].shape[-1]

    BT = _pick_batch_tile(B, S)
    n_bt = B // BT
    rows = BT * S

    kernel = functools.partial(encoder_stack_kernel, n_heads=n_heads, d_k=d_k,
                               eps=eps, batch=BT, seq=S)

    # rough per-step VMEM footprint: double-buffered bf16 per-layer weights + f32 activations /
    # intermediates; clamp to [32 MiB, 64 MiB] so it is valid on v5e / v6e / v7x.
    wbytes = 2 * 2 * (D * 3 * HD + 3 * HD + HD * D + D + D * F + F + F * D + D)
    abytes = 4 * (3 * rows * D + 2 * rows * 3 * HD + 2 * n_heads * rows * S + 2 * rows * F)
    vmem_limit = int(min(64 * 1024 * 1024, max(32 * 1024 * 1024, 2 * (wbytes + abytes))))

    return pl.pallas_call(
        kernel,
        out_shape=jax.ShapeDtypeStruct((BS, D), jnp.float32),
        grid=(n_bt, L),
        in_specs=[
            pl.BlockSpec((rows, D), lambda i, l: (i, 0)),            # embedded activations (per tile)
            pl.BlockSpec((BT, 1, S), lambda i, l: (i, 0, 0)),        # additive pad bias
            pl.BlockSpec((1, D), lambda i, l: (0, 0)),               # LN gamma
            pl.BlockSpec((1, D), lambda i, l: (0, 0)),               # LN beta
            pl.BlockSpec((1, D, 3 * HD), lambda i, l: (l, 0, 0)),    # fused QKV weight (per layer)
            pl.BlockSpec((1, 1, 3 * HD), lambda i, l: (l, 0, 0)),    # fused QKV bias
            pl.BlockSpec((1, HD, D), lambda i, l: (l, 0, 0)),        # output projection
            pl.BlockSpec((1, 1, D), lambda i, l: (l, 0, 0)),
            pl.BlockSpec((1, D, F), lambda i, l: (l, 0, 0)),         # FFN fc1
            pl.BlockSpec((1, 1, F), lambda i, l: (l, 0, 0)),
            pl.BlockSpec((1, F, D), lambda i, l: (l, 0, 0)),         # FFN fc2
            pl.BlockSpec((1, 1, D), lambda i, l: (l, 0, 0)),
        ],
        out_specs=pl.BlockSpec((rows, D), lambda i, l: (i, 0)),      # VMEM carry across layers
        compiler_params=pltpu.CompilerParams(
            dimension_semantics=("parallel", "arbitrary"),           # batch tiles across TCs
            vmem_limit_bytes=vmem_limit),
    )(x2, mask_bias, p['ln_gamma2'], p['ln_beta2'],
      p['wqkv'], p['bqkv'], p['wo'], p['bo'],
      p['w1'], p['b1'], p['w2'], p['b2'])


def heads(cls_vec, h_masked2, p, vocab_size):
    B, D = cls_vec.shape
    BP = h_masked2.shape[0]
    embT = p['embT']
    tile_v, v_pad = _vocab_tiling(vocab_size)
    c_pad = p['wc_pad'].shape[-1]

    # pooler + classifier + LM hidden (small, single invocation, whole arrays in VMEM)
    clsf_pad, g = pl.pallas_call(
        pooler_heads_kernel,
        out_shape=(jax.ShapeDtypeStruct((B, c_pad), jnp.float32),
                   jax.ShapeDtypeStruct((BP, D), jnp.float32)),
    )(cls_vec, h_masked2, p['wp'], p['bp'], p['wc_pad'], p['bc_pad'], p['wl'], p['bl'])

    # tied-weight LM logits, tiled over the vocab axis ("parallel" grid, lane-dense 128-mult stores)
    n_tiles = v_pad // tile_v
    lm_pad = pl.pallas_call(
        lm_logits_kernel,
        out_shape=jax.ShapeDtypeStruct((BP, v_pad), jnp.float32),
        grid=(n_tiles,),
        in_specs=[pl.BlockSpec((BP, D), lambda j: (0, 0)),
                  pl.BlockSpec((D, tile_v), lambda j: (0, j))],
        out_specs=pl.BlockSpec((BP, tile_v), lambda j: (0, j)),
        compiler_params=pltpu.CompilerParams(dimension_semantics=("parallel",)),
    )(g, embT)

    return clsf_pad[:, :2], lm_pad[:, :vocab_size]


# ---------------------------------------------------------------------------
# One-time parameter preprocessing (hoisted out of the forward hot path)
# ---------------------------------------------------------------------------
def prepare_params(params, cfg):
    D = cfg['d_model']
    dk = cfg['d_k']
    V = cfg['vocab_size']
    scale = 1.0 / math.sqrt(dk)

    def st(name):
        return jnp.stack([lp[name] for lp in params['layers']], axis=0)

    # fuse Q/K/V and fold the attention scale into the Q columns
    wqkv = jnp.concatenate([st('wq') * scale, st('wk'), st('wv')], axis=-1)
    bqkv = jnp.concatenate([st('bq') * scale, st('bk'), st('bv')], axis=-1)[:, None, :]

    lane = 128
    c_pad = lane
    _, v_pad = _vocab_tiling(V)
    embT = jnp.zeros((D, v_pad), jnp.bfloat16).at[:, :V].set(
        params['tok_embed'].T.astype(jnp.bfloat16))              # tied weight, pre-transposed
    wc_pad = jnp.zeros((D, c_pad), jnp.bfloat16).at[:, :2].set(params['wc'].astype(jnp.bfloat16))
    bc_pad = jnp.zeros((1, c_pad), jnp.float32).at[:, :2].set(params['bc'][None, :])

    return {
        'tok_embed': params['tok_embed'],
        'pos_embed': params['pos_embed'],
        'seg_embed': params['seg_embed'],
        'ln_gamma2': params['ln_gamma'].reshape(1, D),
        'ln_beta2': params['ln_beta'].reshape(1, D),
        'wqkv': wqkv.astype(jnp.bfloat16), 'bqkv': bqkv,
        'wo': st('wo').astype(jnp.bfloat16), 'bo': st('bo')[:, None, :],
        'w1': st('w1').astype(jnp.bfloat16), 'b1': st('b1')[:, None, :],
        'w2': st('w2').astype(jnp.bfloat16), 'b2': st('b2')[:, None, :],
        'wp': params['wp'].astype(jnp.bfloat16), 'bp': params['bp'].reshape(1, D),
        'wc_pad': wc_pad, 'bc_pad': bc_pad,
        'wl': params['wl'].astype(jnp.bfloat16), 'bl': params['bl'].reshape(1, D),
        'embT': embT,
    }


# ---------------------------------------------------------------------------
# Model glue (embedding gathers / torch.gather equivalents stay in plain JAX)
# ---------------------------------------------------------------------------
def bert_forward(prepped, cfg, input_ids, segment_ids, masked_pos):
    B, S = input_ids.shape
    D = cfg['d_model']

    # Embedding: tok + pos + seg (LayerNorm is fused into the encoder-stack kernel)
    pos = jnp.arange(S, dtype=jnp.int32)[None, :]
    emb = (prepped['tok_embed'][input_ids]
           + prepped['pos_embed'][pos]
           + prepped['seg_embed'][segment_ids])                  # [B, S, D] f32
    x2 = emb.reshape(B * S, D)

    # additive key-pad bias [B, 1, S]: -1e9 where input_ids == 0 (broadcast in-kernel)
    mask_bias = jnp.where(input_ids == 0, -1e9, 0.0).astype(jnp.float32)[:, None, :]

    out2 = encoder_stack(x2, mask_bias, prepped, n_heads=cfg['n_heads'], d_k=cfg['d_k'])
    x = out2.reshape(B, S, D)

    # pooler input ([CLS] position) and masked-position gather (torch.gather equivalent)
    cls_vec = x[:, 0, :]                                         # [B, D]
    idx = masked_pos[:, :, None].astype(jnp.int32)
    h_masked = jnp.take_along_axis(x, idx, axis=1)               # [B, max_pred, D]
    P = masked_pos.shape[1]
    h_masked2 = h_masked.reshape(B * P, D)

    logits_clsf, lm2 = heads(cls_vec, h_masked2, prepped, cfg['vocab_size'])
    logits_lm = lm2.reshape(B, P, cfg['vocab_size'])
    return logits_lm, logits_clsf


def init_params(key, cfg):
    n_keys = 6 + 6 * cfg['n_layers']
    ks = iter(jax.random.split(key, n_keys))

    def w(shape, scale=0.02):
        return jax.random.normal(next(ks), shape, jnp.float32) * scale

    D, V = cfg['d_model'], cfg['vocab_size']
    HD = cfg['n_heads'] * cfg['d_k']
    params = {
        'tok_embed': w((V, D)),
        'pos_embed': w((cfg['maxlen'], D)),
        'seg_embed': w((cfg['n_segments'], D)),
        'ln_gamma': jnp.ones((D,), jnp.float32),
        'ln_beta': jnp.zeros((D,), jnp.float32),
        'wp': w((D, D)), 'bp': jnp.zeros((D,), jnp.float32),     # pooler (fc)
        'wc': w((D, 2)), 'bc': jnp.zeros((2,), jnp.float32),     # classifier
        'wl': w((D, D)), 'bl': jnp.zeros((D,), jnp.float32),     # LM linear
        'layers': [],
    }
    for _ in range(cfg['n_layers']):
        params['layers'].append({
            'wq': w((D, HD)), 'bq': jnp.zeros((HD,), jnp.float32),
            'wk': w((D, HD)), 'bk': jnp.zeros((HD,), jnp.float32),
            'wv': w((D, HD)), 'bv': jnp.zeros((HD,), jnp.float32),
            'wo': w((HD, D)), 'bo': jnp.zeros((D,), jnp.float32),
            'w1': w((D, cfg['d_ff'])), 'b1': jnp.zeros((cfg['d_ff'],), jnp.float32),
            'w2': w((cfg['d_ff'], D)), 'b2': jnp.zeros((D,), jnp.float32),
        })
    return params


if __name__ == "__main__":
    cfg = dict(vocab_size=48, maxlen=16, n_segments=2, d_model=32,
               n_heads=4, d_k=8, d_ff=64, n_layers=2, max_pred=4, dropout=0.1)
    # NOTE: at these toy dims (D=32, HD=32, F=64) the kernels are launch/DMA-overhead bound;
    # the structure (lane-dense tiles, batched heads, vocab tiling) targets production shapes.

    root = jax.random.PRNGKey(0)
    kp, k1, k2 = jax.random.split(root, 3)
    params = init_params(kp, cfg)
    prepped = prepare_params(params, cfg)                        # one-time, outside the hot path

    B, S = 2, 8
    input_ids = jax.random.randint(k1, (B, S), 1, cfg['vocab_size'], dtype=jnp.int32)
    input_ids = input_ids.at[:, -2:].set(0)                      # padding tokens
    segment_ids = jnp.concatenate(
        [jnp.zeros((B, S // 2), jnp.int32), jnp.ones((B, S // 2), jnp.int32)], axis=1)
    masked_pos = jax.random.randint(k2, (B, cfg['max_pred']), 0, S, dtype=jnp.int32)

    logits_lm, logits_clsf = bert_forward(prepped, cfg, input_ids, segment_ids, masked_pos)
    jax.block_until_ready((logits_lm, logits_clsf))

    assert logits_lm.shape == (B, cfg['max_pred'], cfg['vocab_size'])
    assert logits_clsf.shape == (B, 2)
    assert logits_lm.dtype == jnp.float32 and logits_clsf.dtype == jnp.float32
    assert bool(jnp.all(jnp.isfinite(logits_lm))) and bool(jnp.all(jnp.isfinite(logits_clsf)))
    print("KERNEL_OK")
</pallas_src>

<mosaic_0001>
module attributes {stable_mosaic.version = 11 : i64} {
  func.func @encoder_stack_kernel(%arg0: i32, %arg1: i32, %arg2: memref<8x32xf32, #tpu.memory_space<vmem>>, %arg3: memref<1x1x8xf32, #tpu.memory_space<vmem>>, %arg4: memref<1x32xf32, #tpu.memory_space<vmem>>, %arg5: memref<1x32xf32, #tpu.memory_space<vmem>>, %arg6: memref<1x32x96xbf16, #tpu.memory_space<vmem>>, %arg7: memref<1x1x96xf32, #tpu.memory_space<vmem>>, %arg8: memref<1x32x32xbf16, #tpu.memory_space<vmem>>, %arg9: memref<1x1x32xf32, #tpu.memory_space<vmem>>, %arg10: memref<1x32x64xbf16, #tpu.memory_space<vmem>>, %arg11: memref<1x1x64xf32, #tpu.memory_space<vmem>>, %arg12: memref<1x64x32xbf16, #tpu.memory_space<vmem>>, %arg13: memref<1x1x32xf32, #tpu.memory_space<vmem>>, %arg14: memref<8x32xf32, #tpu.memory_space<vmem>>) attributes {dimension_semantics = [#tpu.dimension_semantics<parallel>, #tpu.dimension_semantics<arbitrary>], iteration_bounds = array<i64: 2, 2>, scalar_prefetch = 0 : i64, scratch_operands = 0 : i64, tpu.core_type = #tpu.core_type<tc>, window_params = [{transform_indices = @transform_0, window_bounds = array<i64: 8, 32>}, {transform_indices = @transform_1, window_bounds = array<i64: 1, 1, 8>}, {pipeline_mode = #tpu.pipeline_mode<synchronous>, transform_indices = @transform_2, window_bounds = array<i64: 1, 32>}, {pipeline_mode = #tpu.pipeline_mode<synchronous>, transform_indices = @transform_3, window_bounds = array<i64: 1, 32>}, {transform_indices = @transform_4, window_bounds = array<i64: 1, 32, 96>}, {transform_indices = @transform_5, window_bounds = array<i64: 1, 1, 96>}, {transform_indices = @transform_6, window_bounds = array<i64: 1, 32, 32>}, {transform_indices = @transform_7, window_bounds = array<i64: 1, 1, 32>}, {transform_indices = @transform_8, window_bounds = array<i64: 1, 32, 64>}, {transform_indices = @transform_9, window_bounds = array<i64: 1, 1, 64>}, {transform_indices = @transform_10, window_bounds = array<i64: 1, 64, 32>}, {transform_indices = @transform_11, window_bounds = array<i64: 1, 1, 32>}, {transform_indices = @transform_12, window_bounds = array<i64: 8, 32>}]} {
    %c0_i32 = arith.constant 0 : i32
    %0 = arith.cmpi eq, %arg1, %c0_i32 : i32
    %1 = arith.extui %0 : i1 to i32
    %c0_i32_0 = arith.constant 0 : i32
    %2 = arith.cmpi ne, %1, %c0_i32_0 : i32
    scf.if %2 {
      %c0_53 = arith.constant 0 : index
      %c0_54 = arith.constant 0 : index
      %121 = vector.load %arg2[%c0_53, %c0_54] : memref<8x32xf32, #tpu.memory_space<vmem>>, vector<8x32xf32>
      %cst_55 = arith.constant dense<0.000000e+00> : vector<8xf32>
      %122 = vector.multi_reduction <add>, %121, %cst_55 [1] : vector<8x32xf32> to vector<8xf32>
      %123 = vector.shape_cast %122 : vector<8xf32> to vector<8x1xf32>
      %cst_56 = arith.constant 3.200000e+01 : f32
      %124 = vector.broadcast %cst_56 : f32 to vector<8x1xf32>
      %125 = arith.divf %123, %124 : vector<8x1xf32>
      %126 = vector.broadcast %125 : vector<8x1xf32> to vector<8x32xf32>
      %127 = arith.subf %121, %126 : vector<8x32xf32>
      %128 = arith.mulf %127, %127 : vector<8x32xf32>
      %cst_57 = arith.constant dense<0.000000e+00> : vector<8xf32>
      %129 = vector.multi_reduction <add>, %128, %cst_57 [1] : vector<8x32xf32> to vector<8xf32>
      %130 = vector.shape_cast %129 : vector<8xf32> to vector<8x1xf32>
      %cst_58 = arith.constant 3.200000e+01 : f32
      %131 = vector.broadcast %cst_58 : f32 to vector<8x1xf32>
      %132 = arith.divf %130, %131 : vector<8x1xf32>
      %133 = vector.broadcast %125 : vector<8x1xf32> to vector<8x32xf32>
      %134 = arith.subf %121, %133 : vector<8x32xf32>
      %cst_59 = arith.constant 9.99999974E-6 : f32
      %135 = vector.broadcast %cst_59 : f32 to vector<8x1xf32>
      %136 = arith.addf %132, %135 : vector<8x1xf32>
      %137 = math.rsqrt %136 : vector<8x1xf32>
      %138 = vector.broadcast %137 : vector<8x1xf32> to vector<8x32xf32>
      %139 = arith.mulf %134, %138 : vector<8x32xf32>
      %c0_60 = arith.constant 0 : index
      %c0_61 = arith.constant 0 : index
      %140 = vector.load %arg4[%c0_60, %c0_61] : memref<1x32xf32, #tpu.memory_space<vmem>>, vector<1x32xf32>
      %141 = vector.broadcast %140 : vector<1x32xf32> to vector<8x32xf32>
      %142 = arith.mulf %139, %141 : vector<8x32xf32>
      %c0_62 = arith.constant 0 : index
      %c0_63 = arith.constant 0 : index
      %143 = vector.load %arg5[%c0_62, %c0_63] : memref<1x32xf32, #tpu.memory_space<vmem>>, vector<1x32xf32>
      %144 = vector.broadcast %143 : vector<1x32xf32> to vector<8x32xf32>
      %145 = arith.addf %142, %144 : vector<8x32xf32>
      %c0_64 = arith.constant 0 : index
      %c0_65 = arith.constant 0 : index
      %146 = vector.load %arg14[%c0_64, %c0_65] : memref<8x32xf32, #tpu.memory_space<vmem>>, vector<8x32xf32>
      tpu.vector_store %arg14[%c0_64, %c0_65], %145 {strides = array<i32>} : memref<8x32xf32, #tpu.memory_space<vmem>>, vector<8x32xf32>,
    } else {
    }
    %c0 = arith.constant 0 : index
    %c0_1 = arith.constant 0 : index
    %3 = vector.load %arg14[%c0, %c0_1] : memref<8x32xf32, #tpu.memory_space<vmem>>, vector<8x32xf32>
    %4 = arith.truncf %3 : vector<8x32xf32> to vector<8x32xbf16>
    %c0_2 = arith.constant 0 : index
    %c0_3 = arith.constant 0 : index
    %c0_4 = arith.constant 0 : index
    %5 = vector.load %arg6[%c0_2, %c0_3, %c0_4] : memref<1x32x96xbf16, #tpu.memory_space<vmem>>, vector<1x32x96xbf16>
    %6 = vector.shape_cast %5 : vector<1x32x96xbf16> to vector<32x96xbf16>
    %cst = arith.constant dense<0.000000e+00> : vector<8x96xf32>
    %7 = tpu.matmul %4, %6, %cst {dimension_numbers = #tpu.dot_dimension_numbers<[1], [0], [0], [1], [0, 0, 1, 1], [], []>} : vector<8x32xbf16>, vector<32x96xbf16>, vector<8x96xf32> -> vector<8x96xf32>
    %c0_5 = arith.constant 0 : index
    %c0_6 = arith.constant 0 : index
    %c0_7 = arith.constant 0 : index
    %8 = vector.load %arg7[%c0_5, %c0_6, %c0_7] : memref<1x1x96xf32, #tpu.memory_space<vmem>>, vector<1x1x96xf32>
    %9 = vector.shape_cast %8 : vector<1x1x96xf32> to vector<1x96xf32>
    %10 = vector.broadcast %9 : vector<1x96xf32> to vector<8x96xf32>
    %11 = arith.addf %7, %10 : vector<8x96xf32>
    %12 = vector.shape_cast %11 : vector<8x96xf32> to vector<1x8x96xf32>
    %13 = vector.extract_strided_slice %12 {offsets = [0, 0, 0], sizes = [1, 8, 8], strides = [1, 1, 1]} : vector<1x8x96xf32> to vector<1x8x8xf32>
    %14 = vector.extract_strided_slice %12 {offsets = [0, 0, 8], sizes = [1, 8, 8], strides = [1, 1, 1]} : vector<1x8x96xf32> to vector<1x8x8xf32>
    %15 = vector.extract_strided_slice %12 {offsets = [0, 0, 16], sizes = [1, 8, 8], strides = [1, 1, 1]} : vector<1x8x96xf32> to vector<1x8x8xf32>
    %16 = vector.extract_strided_slice %12 {offsets = [0, 0, 24], sizes = [1, 8, 8], strides = [1, 1, 1]} : vector<1x8x96xf32> to vector<1x8x8xf32>
    %17 = tpu.concatenate %13, %14, %15, %16 in 0 : vector<1x8x8xf32>, vector<1x8x8xf32>, vector<1x8x8xf32>, vector<1x8x8xf32> -> vector<4x8x8xf32>
    %18 = arith.truncf %17 : vector<4x8x8xf32> to vector<4x8x8xbf16>
    %19 = vector.extract_strided_slice %12 {offsets = [0, 0, 32], sizes = [1, 8, 8], strides = [1, 1, 1]} : vector<1x8x96xf32> to vector<1x8x8xf32>
    %20 = vector.extract_strided_slice %12 {offsets = [0, 0, 40], sizes = [1, 8, 8], strides = [1, 1, 1]} : vector<1x8x96xf32> to vector<1x8x8xf32>
    %21 = vector.extract_strided_slice %12 {offsets = [0, 0, 48], sizes = [1, 8, 8], strides = [1, 1, 1]} : vector<1x8x96xf32> to vector<1x8x8xf32>
    %22 = vector.extract_strided_slice %12 {offsets = [0, 0, 56], sizes = [1, 8, 8], strides = [1, 1, 1]} : vector<1x8x96xf32> to vector<1x8x8xf32>
    %23 = tpu.concatenate %19, %20, %21, %22 in 0 : vector<1x8x8xf32>, vector<1x8x8xf32>, vector<1x8x8xf32>, vector<1x8x8xf32> -> vector<4x8x8xf32>
    %24 = arith.truncf %23 : vector<4x8x8xf32> to vector<4x8x8xbf16>
    %25 = vector.extract_strided_slice %12 {offsets = [0, 0, 64], sizes = [1, 8, 8], strides = [1, 1, 1]} : vector<1x8x96xf32> to vector<1x8x8xf32>
    %26 = vector.extract_strided_slice %12 {offsets = [0, 0, 72], sizes = [1, 8, 8], strides = [1, 1, 1]} : vector<1x8x96xf32> to vector<1x8x8xf32>
    %27 = vector.extract_strided_slice %12 {offsets = [0, 0, 80], sizes = [1, 8, 8], strides = [1, 1, 1]} : vector<1x8x96xf32> to vector<1x8x8xf32>
    %28 = vector.extract_strided_slice %12 {offsets = [0, 0, 88], sizes = [1, 8, 8], strides = [1, 1, 1]} : vector<1x8x96xf32> to vector<1x8x8xf32>
    %29 = tpu.concatenate %25, %26, %27, %28 in 0 : vector<1x8x8xf32>, vector<1x8x8xf32>, vector<1x8x8xf32>, vector<1x8x8xf32> -> vector<4x8x8xf32>
    %30 = arith.truncf %29 : vector<4x8x8xf32> to vector<4x8x8xbf16>
    "tpu.trace_start"() <{level = 10 : i32, message = "nqd,nkd->nqk"}> : () -> ()
    %cst_8 = arith.constant dense<0.000000e+00> : vector<4x8x8xf32>
    %31 = tpu.matmul %18, %24, %cst_8 {dimension_numbers = #tpu.dot_dimension_numbers<[2], [2], [1], [1], [0, 0, 0, 1, 1, 1], [0], [0]>} : vector<4x8x8xbf16>, vector<4x8x8xbf16>, vector<4x8x8xf32> -> vector<4x8x8xf32>
    "tpu.trace_stop"() : () -> ()
    %32 = vector.shape_cast %31 : vector<4x8x8xf32> to vector<4x1x8x8xf32>
    %c0_9 = arith.constant 0 : index
    %c0_10 = arith.constant 0 : index
    %c0_11 = arith.constant 0 : index
    %33 = vector.load %arg3[%c0_9, %c0_10, %c0_11] : memref<1x1x8xf32, #tpu.memory_space<vmem>>, vector<1x1x8xf32>
    %34 = vector.shape_cast %33 : vector<1x1x8xf32> to vector<1x1x1x8xf32>
    %35 = vector.broadcast %34 : vector<1x1x1x8xf32> to vector<4x1x8x8xf32>
    %36 = arith.addf %32, %35 : vector<4x1x8x8xf32>
    %cst_12 = arith.constant dense<0xFF800000> : vector<4x1x8xf32>
    %37 = vector.multi_reduction <maximumf>, %36, %cst_12 [3] : vector<4x1x8x8xf32> to vector<4x1x8xf32>
    %38 = vector.shape_cast %37 : vector<4x1x8xf32> to vector<4x1x8x1xf32>
    %39 = vector.broadcast %38 : vector<4x1x8x1xf32> to vector<4x1x8x8xf32>
    %40 = arith.subf %36, %39 : vector<4x1x8x8xf32>
    %41 = math.exp %40 : vector<4x1x8x8xf32>
    %cst_13 = arith.constant dense<0.000000e+00> : vector<4x1x8xf32>
    %42 = vector.multi_reduction <add>, %41, %cst_13 [3] : vector<4x1x8x8xf32> to vector<4x1x8xf32>
    %43 = vector.shape_cast %42 : vector<4x1x8xf32> to vector<4x1x8x1xf32>
    %44 = tpu.reciprocal %43 {approx = true} : vector<4x1x8x1xf32> -> vector<4x1x8x1xf32>
    %45 = vector.broadcast %44 : vector<4x1x8x1xf32> to vector<4x1x8x8xf32>
    %46 = arith.mulf %41, %45 : vector<4x1x8x8xf32>
    %47 = vector.shape_cast %46 : vector<4x1x8x8xf32> to vector<4x8x8xf32>
    %48 = arith.truncf %47 : vector<4x8x8xf32> to vector<4x8x8xbf16>
    "tpu.trace_start"() <{level = 10 : i32, message = "nqk,nkd->nqd"}> : () -> ()
    %cst_14 = arith.constant dense<0.000000e+00> : vector<4x8x8xf32>
    %49 = tpu.matmul %48, %30, %cst_14 {dimension_numbers = #tpu.dot_dimension_numbers<[2], [1], [1], [2], [0, 0, 0, 1, 1, 2], [0], [0]>} : vector<4x8x8xbf16>, vector<4x8x8xbf16>, vector<4x8x8xf32> -> vector<4x8x8xf32>
    "tpu.trace_stop"() : () -> ()
    %50 = vector.extract_strided_slice %49 {offsets = [0, 0, 0], sizes = [1, 8, 8], strides = [1, 1, 1]} : vector<4x8x8xf32> to vector<1x8x8xf32>
    %51 = vector.extract_strided_slice %49 {offsets = [1, 0, 0], sizes = [1, 8, 8], strides = [1, 1, 1]} : vector<4x8x8xf32> to vector<1x8x8xf32>
    %52 = vector.extract_strided_slice %49 {offsets = [2, 0, 0], sizes = [1, 8, 8], strides = [1, 1, 1]} : vector<4x8x8xf32> to vector<1x8x8xf32>
    %53 = vector.extract_strided_slice %49 {offsets = [3, 0, 0], sizes = [1, 8, 8], strides = [1, 1, 1]} : vector<4x8x8xf32> to vector<1x8x8xf32>
    %54 = tpu.concatenate %50, %51, %52, %53 in 2 : vector<1x8x8xf32>, vector<1x8x8xf32>, vector<1x8x8xf32>, vector<1x8x8xf32> -> vector<1x8x32xf32>
    %55 = vector.shape_cast %54 : vector<1x8x32xf32> to vector<8x32xf32>
    %56 = arith.truncf %55 : vector<8x32xf32> to vector<8x32xbf16>
    %c0_15 = arith.constant 0 : index
    %c0_16 = arith.constant 0 : index
    %c0_17 = arith.constant 0 : index
    %57 = vector.load %arg8[%c0_15, %c0_16, %c0_17] : memref<1x32x32xbf16, #tpu.memory_space<vmem>>, vector<1x32x32xbf16>
    %58 = vector.shape_cast %57 : vector<1x32x32xbf16> to vector<32x32xbf16>
    %cst_18 = arith.constant dense<0.000000e+00> : vector<8x32xf32>
    %59 = tpu.matmul %56, %58, %cst_18 {dimension_numbers = #tpu.dot_dimension_numbers<[1], [0], [0], [1], [0, 0, 1, 1], [], []>} : vector<8x32xbf16>, vector<32x32xbf16>, vector<8x32xf32> -> vector<8x32xf32>
    %c0_19 = arith.constant 0 : index
    %c0_20 = arith.constant 0 : index
    %c0_21 = arith.constant 0 : index
    %60 = vector.load %arg9[%c0_19, %c0_20, %c0_21] : memref<1x1x32xf32, #tpu.memory_space<vmem>>, vector<1x1x32xf32>
    %61 = vector.shape_cast %60 : vector<1x1x32xf32> to vector<1x32xf32>
    %62 = vector.broadcast %61 : vector<1x32xf32> to vector<8x32xf32>
    %63 = arith.addf %59, %62 : vector<8x32xf32>
    %64 = arith.truncf %63 : vector<8x32xf32> to vector<8x32xbf16>
    %c0_22 = arith.constant 0 : index
    %c0_23 = arith.constant 0 : index
    %c0_24 = arith.constant 0 : index
    %65 = vector.load %arg10[%c0_22, %c0_23, %c0_24] : memref<1x32x64xbf16, #tpu.memory_space<vmem>>, vector<1x32x64xbf16>
    %66 = vector.shape_cast %65 : vector<1x32x64xbf16> to vector<32x64xbf16>
    %cst_25 = arith.constant dense<0.000000e+00> : vector<8x64xf32>
    %67 = tpu.matmul %64, %66, %cst_25 {dimension_numbers = #tpu.dot_dimension_numbers<[1], [0], [0], [1], [0, 0, 1, 1], [], []>} : vector<8x32xbf16>, vector<32x64xbf16>, vector<8x64xf32> -> vector<8x64xf32>
    %c0_26 = arith.constant 0 : index
    %c0_27 = arith.constant 0 : index
    %c0_28 = arith.constant 0 : index
    %68 = vector.load %arg11[%c0_26, %c0_27, %c0_28] : memref<1x1x64xf32, #tpu.memory_space<vmem>>, vector<1x1x64xf32>
    %69 = vector.shape_cast %68 : vector<1x1x64xf32> to vector<1x64xf32>
    %70 = vector.broadcast %69 : vector<1x64xf32> to vector<8x64xf32>
    %71 = arith.addf %67, %70 : vector<8x64xf32>
    %cst_29 = arith.constant 5.000000e-01 : f32
    %72 = vector.broadcast %cst_29 : f32 to vector<8x64xf32>
    %73 = arith.mulf %71, %72 : vector<8x64xf32>
    %cst_30 = arith.constant 0.707106769 : f32
    %74 = vector.broadcast %cst_30 : f32 to vector<8x64xf32>
    %75 = arith.mulf %71, %74 : vector<8x64xf32>
    %76 = math.absf %75 : vector<8x64xf32>
    %cst_31 = arith.constant 0.327591091 : f32
    %77 = vector.broadcast %cst_31 : f32 to vector<8x64xf32>
    %78 = arith.mulf %77, %76 : vector<8x64xf32>
    %cst_32 = arith.constant 1.000000e+00 : f32
    %79 = vector.broadcast %cst_32 : f32 to vector<8x64xf32>
    %80 = arith.addf %79, %78 : vector<8x64xf32>
    %cst_33 = arith.constant 1.000000e+00 : f32
    %81 = vector.broadcast %cst_33 : f32 to vector<8x64xf32>
    %82 = arith.divf %81, %80 : vector<8x64xf32>
    %cst_34 = arith.constant 1.06140542 : f32
    %83 = vector.broadcast %cst_34 : f32 to vector<8x64xf32>
    %84 = arith.mulf %82, %83 : vector<8x64xf32>
    %cst_35 = arith.constant -1.45315206 : f32
    %85 = vector.broadcast %cst_35 : f32 to vector<8x64xf32>
    %86 = arith.addf %85, %84 : vector<8x64xf32>
    %87 = arith.mulf %82, %86 : vector<8x64xf32>
    %cst_36 = arith.constant 1.42141378 : f32
    %88 = vector.broadcast %cst_36 : f32 to vector<8x64xf32>
    %89 = arith.addf %88, %87 : vector<8x64xf32>
    %90 = arith.mulf %82, %89 : vector<8x64xf32>
    %cst_37 = arith.constant -0.284496725 : f32
    %91 = vector.broadcast %cst_37 : f32 to vector<8x64xf32>
    %92 = arith.addf %91, %90 : vector<8x64xf32>
    %93 = arith.mulf %82, %92 : vector<8x64xf32>
    %cst_38 = arith.constant 0.254829586 : f32
    %94 = vector.broadcast %cst_38 : f32 to vector<8x64xf32>
    %95 = arith.addf %94, %93 : vector<8x64xf32>
    %96 = arith.mulf %82, %95 : vector<8x64xf32>
    %97 = arith.mulf %76, %76 : vector<8x64xf32>
    %cst_39 = arith.constant 0.000000e+00 : f32
    %98 = vector.broadcast %cst_39 : f32 to vector<8x64xf32>
    %99 = arith.subf %98, %97 : vector<8x64xf32>
    %100 = math.exp %99 : vector<8x64xf32>
    %101 = arith.mulf %96, %100 : vector<8x64xf32>
    %cst_40 = arith.constant 1.000000e+00 : f32
    %102 = vector.broadcast %cst_40 : f32 to vector<8x64xf32>
    %103 = arith.subf %102, %101 : vector<8x64xf32>
    %cst_41 = arith.constant 0.000000e+00 : f32
    %104 = vector.broadcast %cst_41 : f32 to vector<8x64xf32>
    %105 = arith.cmpf olt, %75, %104 : vector<8x64xf32>
    %cst_42 = arith.constant 0.000000e+00 : f32
    %106 = vector.broadcast %cst_42 : f32 to vector<8x64xf32>
    %107 = arith.subf %106, %103 : vector<8x64xf32>
    %108 = arith.select %105, %107, %103 : vector<8x64xi1>, vector<8x64xf32>
    %cst_43 = arith.constant 1.000000e+00 : f32
    %109 = vector.broadcast %cst_43 : f32 to vector<8x64xf32>
    %110 = arith.addf %109, %108 : vector<8x64xf32>
    %111 = arith.mulf %73, %110 : vector<8x64xf32>
    %112 = arith.truncf %111 : vector<8x64xf32> to vector<8x64xbf16>
    %c0_44 = arith.constant 0 : index
    %c0_45 = arith.constant 0 : index
    %c0_46 = arith.constant 0 : index
    %113 = vector.load %arg12[%c0_44, %c0_45, %c0_46] : memref<1x64x32xbf16, #tpu.memory_space<vmem>>, vector<1x64x32xbf16>
    %114 = vector.shape_cast %113 : vector<1x64x32xbf16> to vector<64x32xbf16>
    %cst_47 = arith.constant dense<0.000000e+00> : vector<8x32xf32>
    %115 = tpu.matmul %112, %114, %cst_47 {dimension_numbers = #tpu.dot_dimension_numbers<[1], [0], [0], [1], [0, 0, 1, 1], [], []>} : vector<8x64xbf16>, vector<64x32xbf16>, vector<8x32xf32> -> vector<8x32xf32>
    %c0_48 = arith.constant 0 : index
    %c0_49 = arith.constant 0 : index
    %c0_50 = arith.constant 0 : index
    %116 = vector.load %arg13[%c0_48, %c0_49, %c0_50] : memref<1x1x32xf32, #tpu.memory_space<vmem>>, vector<1x1x32xf32>
    %117 = vector.shape_cast %116 : vector<1x1x32xf32> to vector<1x32xf32>
    %118 = vector.broadcast %117 : vector<1x32xf32> to vector<8x32xf32>
    %119 = arith.addf %115, %118 : vector<8x32xf32>
    %c0_51 = arith.constant 0 : index
    %c0_52 = arith.constant 0 : index
    %120 = vector.load %arg14[%c0_51, %c0_52] : memref<8x32xf32, #tpu.memory_space<vmem>>, vector<8x32xf32>
    tpu.vector_store %arg14[%c0_51, %c0_52], %119 {strides = array<i32>} : memref<8x32xf32, #tpu.memory_space<vmem>>, vector<8x32xf32>,
    return
  }
  func.func @transform_0(%arg0: i32, %arg1: i32) -> (i32, i32) {
    %c0_i32 = arith.constant 0 : i32
    %c0_i32_0 = arith.constant 0 : i32
    return %arg0, %c0_i32 : i32, i32
  }
  func.func @transform_1(%arg0: i32, %arg1: i32) -> (i32, i32, i32) {
    %c0_i32 = arith.constant 0 : i32
    %c0_i32_0 = arith.constant 0 : i32
    %c0_i32_1 = arith.constant 0 : i32
    return %arg0, %c0_i32, %c0_i32_0 : i32, i32, i32
  }
  func.func @transform_2(%arg0: i32, %arg1: i32) -> (i32, i32) {
    %c0_i32 = arith.constant 0 : i32
    %c0_i32_0 = arith.constant 0 : i32
    %c0_i32_1 = arith.constant 0 : i32
    return %c0_i32, %c0_i32_0 : i32, i32
  }
  func.func @transform_3(%arg0: i32, %arg1: i32) -> (i32, i32) {
    %c0_i32 = arith.constant 0 : i32
    %c0_i32_0 = arith.constant 0 : i32
    %c0_i32_1 = arith.constant 0 : i32
    return %c0_i32, %c0_i32_0 : i32, i32
  }
  func.func @transform_4(%arg0: i32, %arg1: i32) -> (i32, i32, i32) {
    %c0_i32 = arith.constant 0 : i32
    %c0_i32_0 = arith.constant 0 : i32
    %c0_i32_1 = arith.constant 0 : i32
    return %arg1, %c0_i32, %c0_i32_0 : i32, i32, i32
  }
  func.func @transform_5(%arg0: i32, %arg1: i32) -> (i32, i32, i32) {
    %c0_i32 = arith.constant 0 : i32
    %c0_i32_0 = arith.constant 0 : i32
    %c0_i32_1 = arith.constant 0 : i32
    return %arg1, %c0_i32, %c0_i32_0 : i32, i32, i32
  }
  func.func @transform_6(%arg0: i32, %arg1: i32) -> (i32, i32, i32) {
    %c0_i32 = arith.constant 0 : i32
    %c0_i32_0 = arith.constant 0 : i32
    %c0_i32_1 = arith.constant 0 : i32
    return %arg1, %c0_i32, %c0_i32_0 : i32, i32, i32
  }
  func.func @transform_7(%arg0: i32, %arg1: i32) -> (i32, i32, i32) {
    %c0_i32 = arith.constant 0 : i32
    %c0_i32_0 = arith.constant 0 : i32
    %c0_i32_1 = arith.constant 0 : i32
    return %arg1, %c0_i32, %c0_i32_0 : i32, i32, i32
  }
  func.func @transform_8(%arg0: i32, %arg1: i32) -> (i32, i32, i32) {
    %c0_i32 = arith.constant 0 : i32
    %c0_i32_0 = arith.constant 0 : i32
    %c0_i32_1 = arith.constant 0 : i32
    return %arg1, %c0_i32, %c0_i32_0 : i32, i32, i32
  }
  func.func @transform_9(%arg0: i32, %arg1: i32) -> (i32, i32, i32) {
    %c0_i32 = arith.constant 0 : i32
    %c0_i32_0 = arith.constant 0 : i32
    %c0_i32_1 = arith.constant 0 : i32
    return %arg1, %c0_i32, %c0_i32_0 : i32, i32, i32
  }
  func.func @transform_10(%arg0: i32, %arg1: i32) -> (i32, i32, i32) {
    %c0_i32 = arith.constant 0 : i32
    %c0_i32_0 = arith.constant 0 : i32
    %c0_i32_1 = arith.constant 0 : i32
    return %arg1, %c0_i32, %c0_i32_0 : i32, i32, i32
  }
  func.func @transform_11(%arg0: i32, %arg1: i32) -> (i32, i32, i32) {
    %c0_i32 = arith.constant 0 : i32
    %c0_i32_0 = arith.constant 0 : i32
    %c0_i32_1 = arith.constant 0 : i32
    return %arg1, %c0_i32, %c0_i32_0 : i32, i32, i32
  }
  func.func @transform_12(%arg0: i32, %arg1: i32) -> (i32, i32) {
    %c0_i32 = arith.constant 0 : i32
    %c0_i32_0 = arith.constant 0 : i32
    return %arg0, %c0_i32 : i32, i32
  }
}

</mosaic_0001>

<bundles_post_ra>
// kernel: tpu_custom_call.1
= control target key start
LH: loop header
LB: loop body
LE: loop exit
PB: predicated region body
PF: predicated region fallthrough
CT: control target
= control target key end

     0   :  { %s2649_s0 = inlined_call_operand.hbm [shape: f32[16,32], index: 0, kind: input, shape index: {}]   ;;  %s2650_s1 = inlined_call_operand.hbm [shape: f32[2,1,8], index: 1, kind: input, shape index: {}]   ;;  %s2651_s2 = inlined_call_operand.vmem [shape: f32[1,32], index: 2, kind: input, shape index: {}]   ;;  %s2652_s3 = inlined_call_operand.hbm [shape: f32[1,32], index: 3, kind: input, shape index: {}]   ;;  %s2653_s4 = inlined_call_operand.vmem [shape: bf16[2,32,96], index: 4, kind: input, shape index: {}]   ;;  %s2654_s5 = inlined_call_operand.vmem [shape: f32[2,1,96], index: 5, kind: input, shape index: {}]   ;;  %s2655_s6 = inlined_call_operand.vmem [shape: bf16[2,32,32], index: 6, kind: input, shape index: {}]   ;;  %s2656_s7 = inlined_call_operand.vmem [shape: f32[2,1,32], index: 7, kind: input, shape index: {}]   ;;  %s2657_s8 = inlined_call_operand.vmem [shape: bf16[2,32,64], index: 8, kind: input, shape index: {}]   ;;  %s2658_s9 = inlined_call_operand.vmem [shape: f32[2,1,64], index: 9, kind: input, shape index: {}]   ;;  %s2659_s10 = inlined_call_operand.vmem [shape: bf16[2,64,32], index: 10, kind: input, shape index: {}]   ;;  %s2660_s11 = inlined_call_operand.vmem [shape: f32[2,1,32], index: 11, kind: input, shape index: {}]   ;;  %s2661_s12 = inlined_call_operand.hbm [shape: f32[16,32], index: 12, kind: output, shape index: {}]  }
   0x1   :  { %2673 = sst [smem:[#allocation23_spill]] %s2649_s0 }
   0x2   :  { %2674 = sst [smem:[#allocation24_spill]] %s2650_s1 }
   0x3   :  { %2675 = sst [smem:[#allocation25_spill]] %s2651_s2 }
   0x4   :  { %2676 = sst [smem:[#allocation26_spill]] %s2652_s3 }
   0x5   :  { %2677 = sst [smem:[#allocation27_spill]] %s2653_s4 }
   0x6   :  { %2678 = sst [smem:[#allocation28_spill]] %s2655_s6 }
   0x7   :  { %2679 = sst [smem:[#allocation29_spill]] %s2659_s10 }
   0x8   :  { %2680 = sst [smem:[#allocation30_spill]] %s2660_s11 }
   0x9   :  { %2681 = sst [smem:[#allocation31_spill]] %s2661_s12 }
   0xa   :  { %17 = vsyncpa [#allocation3], 0 }
   0xb   :  { %19 = vsyncpa [#allocation3 + $0x1], 0 }
   0xc   :  { %20 = vsyncpa [#allocation6], 0 }
   0xd   :  { %22 = vsyncpa [#allocation6 + $0x1], 0 }
   0xe   :  { %23 = vsyncpa [#allocation4], 0 }
   0xf   :  { %25 = vsyncpa [#allocation4 + $0x1], 0  ;;  %s2239_s21 = smov 0   ;;  %s2241_s22 = smov 0  }
  0x10   :  { %s2243_s23 = smov 0   ;;  %s2245_s24 = smov 0  }
  0x11   :  { %s2247_s25 = smov 0   ;;  %s2249_s26 = smov 0  }
  0x12   :  { %s2251_s27 = smov 0   ;;  %s2253_s28 = smov 0  }
  0x13 LB: > { %2682 = sst [smem:[#allocation13_spill]] %s2130_s21  ;;  %s2280_s29 = sadd.s32 4294967295, %s2158_s28   ;;  %s2158_s28 = sphi %s2253_s28, %s31_s28   ;;  %s2154_s27 = sphi %s2251_s27, %s2726_s27   ;;  %s2150_s26 = sphi %s2249_s26, %s2725_s26   ;;  %s2146_s25 = sphi %s2247_s25, %s2724_s25   ;;  %s2142_s24 = sphi %s2245_s24, %s2723_s24   ;;  %s2138_s23 = sphi %s2243_s23, %s2722_s23   ;;  %s2134_s22 = sphi %s2241_s22, %s2728_s22   ;;  %s2130_s21 = sphi %s2239_s21, %s2727_s21  }
  0x14   : > { %2683 = sst [smem:[#allocation14_spill]] %s2138_s23  ;;  %s1665_s30 = sadd.s32 4294967294, %s2158_s28  }
  0x15   : > { %2684 = sst [smem:[#allocation15_spill]] %s2146_s25  ;;  %p2664_p0 = scmp.ne.s32.totalorder %s2138_s23, %s2134_s22 }
  0x16   : > { %2685 = sst [smem:[#allocation16_spill]] %s2150_s26  ;;  %p63_p1 = scmp.ne.s32.totalorder %s2134_s22, %s2130_s21 }
  0x17   : > { %2686 = sst [smem:[#allocation17_spill]] %s2154_s27  ;;  %p2665_p2 = scmp.eq.s32.totalorder %s2280_s29, 0 }
  0x18   : > { %p363_p3 = scmp.eq.s32.totalorder %s2280_s29, 3  ;;  %p369_p4 = scmp.eq.s32.totalorder %s1665_s30, 3 }
  0x19   : > { %p2292_p5 = por %p2665_p2, %p63_p1  ;;  %p1666_p6 = scmp.ge.s32.totalorder %s2158_s28, 1 }
  0x1a   : > { %p2300_p7 = por %p363_p3, %p2664_p0  ;;  %p2304_p8 = por %p369_p4, %p63_p1 }
  0x1b   : > { %p376_p9 = scmp.lt.s32.totalorder %s2158_s28, 5  ;;  %s2160_s18 = smov [#allocation7]  }
  0x1c   : > { %s2688_s15 = scalar_select %p2300_p7, 1, 0 }
  0x1d   : > { %s2690_s16 = scalar_select %p2304_p8, 1, 0 }
  0x1e   : > { %2689 = sst [smem:[#allocation18_spill]] %s2688_s15  ;;  %p2309_p10 = pnand %p1666_p6, %p376_p9 }
  0x1f   : > { %2691 = sst [smem:[#allocation19_spill]] %s2690_s16  ;;  %s392_s19 = sshll.u32 %s2160_s18, 4  ;;  %s393_s19 = int_to_ptr.vmem [resolvable:$true] %s392_s19 }
  0x20   : > { %p1846_p11 = pneg %p2309_p10  ;;  %s40_s30 = sadd.s32 1, %s2150_s26 }
  0x21   : > { %p2322_p13 = scmp.ge.s32.totalorder %s40_s30, 2  ;;  %s43_s16 = sadd.s32 1, %s2154_s27 }
  0x22   : > { %p2317_p12 = pnand %p1846_p11, %p2665_p2  ;;  %p58_p1 = scmp.eq.s32.totalorder %s2158_s28, 0 }
  0x23   : > { %s1983_s21 = scalar_lea.vmem %s393_s19, 16  ;;  %s1990_s18 = scalar_lea.vmem %s393_s19, 32 }
  0x24   : > { %p1974_p3 = pneg %p2317_p12  ;;  %p1984_p4 = scmp.ne.s32.totalorder %s393_s19, %s1983_s21 }
  0x25   : > { %p1991_p0 = scmp.lt.s32.totalorder %s393_s19, %s393_s19  ;;  %p1992_p11 = scmp.lt.s32.totalorder %s1990_s18, %s1983_s21 }
  0x26   : > { %p1986_p6 = pnand %p1984_p4, %p1974_p3 }
  0x27   : > { %p1993_p2 = por %p1992_p11, %p1991_p0 }
  0x28   : > { %p1987_p9 = pneg %p1986_p6 }
  0x2a   : > { %p1994_p8 = pnand %p1993_p2, %p1987_p9 }
  0x2c   : > { %1997 = shalt.err (!%p1994_p8)
}
  0x2d   : > { %s2695_s3 = sld [smem:[#allocation26_spill]]  ;;  %s2730_s30 = smov (%p2322_p13, %s40_s30), 0 }
  0x2e   : > { %2696 = sst [smem:[#allocation20_spill]] %s2730_s30  ;;  %s2732_s16 = smov (!%p2322_p13, %s43_s16), %s2154_s27 }
  0x2f   : > { %p2697_p0 = scmp.ne.s32.totalorder %s2138_s23, %s2134_s22  ;;  %p1862_p8 = scmp.lt.s32.totalorder %s2158_s28, 4 }
  0x30   : > { %p45_p3 = scmp.ge.s32.totalorder %s2732_s16, 2  ;;  %s2353_s21 = sand.u32 1, %s2138_s23  }
  0x31   : > { %p2347_p2 = por %p58_p1, %p2697_p0  ;;  %s1669_s26 = sshll.u32 %s2353_s21, 3 }
  0x32   : > { %s2734_s16 = smov (%p45_p3, %s2732_s16), 0  ;;  %s1670_s13 = sshll.u32 %s2154_s27, 7 }
  0x33   : > { %1849 = dma.hbm_to_vmem [thread:$0]  (!%p2317_p12), %s2695_s3, 16, %s393_s19, [#allocation6]  }
  0x34   : > { %2699 = sst [smem:[#allocation21_spill]] %s2734_s16  ;;  %s47_s19 = ssub.s32 %s2154_s27, %s2734_s16 }
  0x35   : > { %s2700_s0 = sld [smem:[#allocation23_spill]]  ;;  %p48_p12 = scmp.eq.s32.totalorder %s47_s19, 0 }
  0x36   : > { %s407_s30 = scalar_lea.vmem [#allocation2], %s1669_s26  ;;  %p2366_p13 = pnand %p1862_p8, %p2347_p2 }
  0x37   : > { %s414_s15 = sshll.u32 %s407_s30, 4  ;;  %s2702_s2 = sadd.s32 1, %s2138_s23  ;;  %s415_s15 = int_to_ptr.vmem [resolvable:$true] %s414_s15 }
  0x38   : > { %s2373_s11 = scalar_select %p48_p12, %s2138_s23, %s2702_s2  }
  0x39   : > { %s421_s10 = sand.u32 1, %s2158_s28   ;;  %s404_s16 = scalar_lea.sflag [#allocation3], %s2353_s21 }
  0x3a   : > { %2703 = sst [smem:[#allocation22_spill]] %s2373_s11  ;;  %p2000_p1 = pneg %p2366_p13 }
  0x3b   : > { %s412_s3 = scalar_lea.hbm %s2700_s0, %s1670_s13  ;;  %s2011_s20 = scalar_lea.vmem %s415_s15, 128 }
  0x3c   : > { %p2012_p4 = scmp.ne.s32.totalorder %s415_s15, %s2011_s20  ;;  %s2161_s30 = smov [#allocation2]  }
  0x3d   : > { %s2016_s12 = sshll.u32 %s2161_s30, 4  ;;  %s2017_s12 = int_to_ptr.vmem [resolvable:$false] %s2016_s12 }
  0x3e   : > { %p2014_p6 = pnand %p2012_p4, %p2000_p1  ;;  %s2018_s26 = scalar_lea.vmem %s2017_s12, 256 }
  0x3f   : > { %p2019_p11 = scmp.lt.s32.totalorder %s415_s15, %s2017_s12  ;;  %p2020_p0 = scmp.lt.s32.totalorder %s2018_s26, %s2011_s20 }
  0x40   : > { %p2015_p9 = pneg %p2014_p6 }
  0x41   : > { %p2021_p2 = por %p2020_p0, %p2019_p11 }
  0x43   : > { %p2022_p8 = pnand %p2021_p2, %p2015_p9 }
  0x45   : > { %2025 = shalt.err (!%p2022_p8)
}
  0x46   : > { %1853 = dma.hbm_to_vmem [thread:$0]  (!%p2366_p13), %s412_s3, 128, %s415_s15, %s404_s16  }
  0x47   : > { %s1671_s2 = sshll.u32 %s2154_s27, 4  ;;  %s424_s13 = scalar_lea.vmem [#allocation5], %s2353_s21 }
  0x48   : > { %s431_s19 = sshll.u32 %s424_s13, 4  ;;  %s2704_s1 = sld [smem:[#allocation24_spill]]  ;;  %s432_s19 = int_to_ptr.vmem [resolvable:$true] %s431_s19 }
  0x49   : > { %s422_s11 = scalar_lea.sflag [#allocation6], %s421_s10  ;;  %s2039_s12 = scalar_lea.vmem %s432_s19, 16 }
  0x4a   : > { %p2040_p3 = scmp.ne.s32.totalorder %s432_s19, %s2039_s12  ;;  %s2162_s20 = smov [#allocation5]  }
  0x4b   : > { %s2044_s26 = sshll.u32 %s2162_s20, 4  ;;  %s2045_s26 = int_to_ptr.vmem [resolvable:$false] %s2044_s26 }
  0x4c   : > { %p2042_p12 = pnand %p2040_p3, %p2000_p1  ;;  %s2046_s23 = scalar_lea.vmem %s2045_s26, 32 }
  0x4d   : > { %p2047_p6 = scmp.lt.s32.totalorder %s432_s19, %s2045_s26  ;;  %p2048_p9 = scmp.lt.s32.totalorder %s2046_s23, %s2039_s12 }
  0x4e   : > { %s429_s30 = scalar_lea.hbm %s2704_s1, %s1671_s2  ;;  %p2043_p4 = pneg %p2042_p12 }
  0x4f   : > { %p2049_p11 = por %p2048_p9, %p2047_p6 }
  0x51   : > { %p2050_p0 = pnand %p2049_p11, %p2043_p4 }
  0x53   : > { %2053 = shalt.err (!%p2050_p0)
}
  0x54   : > { %1856 = dma.hbm_to_vmem [thread:$0]  (!%p2366_p13), %s429_s30, 16, %s432_s19, %s422_s11  }
  0x55   : > { %496 = sbr.rel (%p2309_p10) target bundleno = 2347 (0x92b), region = 68  ;;  %s2397_s0 = sand.u32 (!%p2309_p10), 1, %s2134_s22  }
  0x56   : > { %s1673_s3 = sshll.u32 (!%p2309_p10), %s2397_s0, 3  ;;  %s499_s10 = scalar_lea.sflag (!%p2309_p10), [#allocation3], %s2397_s0 }
  0x57   : > { %s502_s15 = scalar_lea.vmem (!%p2309_p10), [#allocation2], %s1673_s3 }
  0x5a   : > { %2113 = dma.done.wait (%p2292_p5), %s499_s10, 128  }
  0x5b   : > { %2115 = vsyncadd (%p2292_p5), %s499_s10, 4294967168  ;;  %s507_s11 = sand.u32 1, %s2280_s29  }
  0x5c   : > { %s508_s23 = scalar_lea.sflag [#allocation6], %s507_s11 }
  0x5d   : > { %2117 = dma.done.wait (%p2292_p5), %s508_s23, 16  }
  0x5e   : > { %2119 = vsyncadd (%p2292_p5), %s508_s23, 4294967280  ;;  %p2705_p10 = scmp.eq.s32.totalorder %s2280_s29, 0 }
  0x60   : > { %2121 = dma.done.wait (%p2705_p10), [#allocation6], 16   ;;  %p2706_p13 = pmov %p2705_p10 }
  0x61   : > { %p591_p1 = scmp.lt.s32.totalorder %s2142_s24, 1  ;;  %s2707_s4 = sld [smem:[#allocation27_spill]] }
  0x62   : > { %2123 = vsyncadd (%p2706_p13), [#allocation6], 4294967280  ;;  %s2708_s6 = sld [smem:[#allocation28_spill]]  ;;  %s2457_s26 = scalar_lea.vmem [#allocation8], %s1673_s3 }
  0x63   : > { %s2417_s16 = scalar_select %p591_p1, %s2142_s24, 1 }
  0x64   : > { %s2710_s27 = sld [smem:[#allocation30_spill]]  ;;  %p1684_p5 = scmp.ne.s32.totalorder %s2142_s24, 0 }
  0x65   : > { %s1718_s17 = sshll.u32 %s2417_s16, 4  ;;  %s606_s10 = scalar_lea.vmem %s2656_s7, %s2417_s16 }
  0x66   : > { %s2441_s25 = scalar_lea.vmem %s2657_s8, %s1718_s17  ;;  %s614_s13 = scalar_lea.vmem %s2658_s9, %s2417_s16 }
  0x67   : > { %s2427_s29 = scalar_lea.vmem %s2707_s4, %s1718_s17  ;;  %s1721_s19 = sshll.u32 %s2417_s16, 5 }
  0x68   : > { %s2432_s12 = scalar_lea.vmem %s2708_s6, %s1718_s17  ;;  %s2709_s4 = sld [smem:[#allocation29_spill]] }
  0x69   : > { %s2711_s6 = sld [smem:[#allocation25_spill]] (!%p1684_p5) }
  0x6a   : > { %s622_s20 = scalar_lea.vmem %s2710_s27, %s2417_s16  ;;  %627 = sbr.rel (%p1684_p5) target bundleno = 421 (0x1a5), region = 84 }
  0x6e   : > { %s2451_s18 = scalar_lea.vmem %s2709_s4, %s1721_s19 }
  0x6f   : > { %v628_v0 = vld [vmem:[%s502_s15] sm:$0xff]  ;;  %vm629_vm0 = vcmask 261120   ;;  %v1686_v13 = vld [vmem:[#allocation7] ss:$0 sm:$0xff] }
  0x70   : > { %v630_v1 = vsel %vm629_vm0, %v628_v0, 0.0  ;;  %v1685_v11 = vld [vmem:[%s2711_s6] ss:$0 sm:$0xff] }
  0x71   : > { %631 = vadd.xlane.f32.xlu0 %v630_v1 }
  0xfa   : > { %v632_v2 = vpop.xlane.xlu0 %631 }
  0xfb   : > { %v634_v3 = vmul.f32 0.03125, %v632_v2 }
  0xfd   : > { %v635_v4 = vsub.f32 %v628_v0, %v634_v3 }
  0xff   : > { %v636_v5 = vmul.f32 %v635_v4, %v635_v4 }
 0x101   : > { %v637_v6 = vsel %vm629_vm0, %v636_v5, 0.0 }
 0x102   : > { %638 = vadd.xlane.f32.xlu0 %v637_v6 }
 0x18b   : > { %v639_v7 = vpop.xlane.xlu0 %638 }
 0x18c   : > { %v640_v8 = vmul.f32 0.03125, %v639_v7 }
 0x18e   : > { %v641_v9 = vadd.f32 1e-05, %v640_v8 }
 0x190   : > { %1940 = vrsqrt.f32 %v641_v9 }
 0x19d   : > { %v1941_v10 = vpop.eup %1940 }
 0x19e   : > { %v643_v12 = vmul.f32 %v1941_v10, %v635_v4 }
 0x1a0   : > { %v651_v14 = vmul.f32 %v1685_v11, %v643_v12 }
 0x1a2   : > { %v659_v15 = vadd.f32 %v1686_v13, %v651_v14 }
 0x1a4   : > { %660 = vst.msk [vmem:[%s2457_s26] sm:$0xff] %vm629_vm0, %v659_v15 }
 0x1a5 PF: > { %v1942_v16 = vld [vmem:[%s2427_s29 + $0x8] sm:$0xff]   ;;  %v2163_v17 = vmov 0.0   ;;  %v1943_v18 = vld [vmem:[%s2427_s29] sm:$0xff]   ;;  %vm2164_vm1 = vmmov 0   ;;  %vm686_vm2 = vcmask 261120   ;;  %s2712_s3 = scalar_lea.vmem %s2654_s5, %s2417_s16  ;;  %s2165_s15 = smov 104  }
 0x1a6   : > { %1752 = vmatprep.subr.bf16.mxu0 %v2163_v17  ;;  %1760 = vmatprep.subr.bf16.mxu1 %v2163_v17  ;;  %v1687_v21 = vld [vmem:[%s2712_s3] ss:$0 sm:$0xff]  ;;  %s2166_s17 = smov 120   ;;  %s2167_s2 = smov 112   ;;  %vm747_vm3 = vcmask 64512   ;;  %vm1005_vm4 = vcmask 1043456  }
 0x1a7   : > { %1753 = vmatpush3.bf16.msra.mxu0 %v1942_v16  ;;  %1756 = vmatprep.mubr.msk.bf16.mxu0 %vm2164_vm1, %v2163_v17  ;;  %s2168_s29 = smov 96   ;;  %s2713_s11 = scalar_lea.vmem [#allocation5], %s2397_s0  ;;  %vm1206_vm5 = vcmask 130048   ;;  %vm1208_vm6 = vcmask 195584   ;;  %vm1411_vm8 = vcmask 523264  }
 0x1a8   : > { %1754 = vmatprep.subr.bf16.mxu0 %v2163_v17  ;;  %1762 = vmatprep.mubr.msk.bf16.mxu1 %vm2164_vm1, %v2163_v17  ;;  %v1695_v42 = vld [vmem:[%s2713_s11] ss:$0 sm:$0xff]  ;;  %s2169_s23 = smov 64   ;;  %s2170_s14 = smov 8  }
 0x1a9   : > { %s2171_s21 = smov 16   ;;  %s1470_s27 = sshll.u32 %s2457_s26, 4  ;;  %s2596_s27 = int_to_ptr.vmem [resolvable:$true] %s1470_s27 }
 0x1aa   : > { %s1457_s16 = scalar_lea.sflag [#allocation4], %s2397_s0 }
 0x1ab   : > { %v661_v19 = vld [vmem:[%s2457_s26] sm:$0xff]  ;;  %1755 = vmatpush3.bf16.msra.mxu0 %v1943_v18 }
 0x1ac   : > { %v662_v20 = vpack.c.bf16 %v661_v19, %v661_v19  ;;  %1766 = vmatprep.subr.bf16.mxu0 %v2163_v17 }
 0x1ae   : > { %1757 = vmatmul.mubr.msk.bf16.vlgmr.msra.gmra.mxu0 %vm686_vm2, %v662_v20 }
 0x1af   : > { %1768 = vmatprep.mubr.msk.bf16.mxu0 %vm2164_vm1, %v2163_v17 }
 0x26e   : > { %v724_v22 = vpop.f32.mrf.mxu0 }
 0x26f   : > { %v725_v23 = vadd.f32 %v1687_v21, %v724_v22 }
 0x270   : > { %v1758_v24 = vpop.f32.mrf.mxu0 }
 0x271   : > { %737 = vrot.lane.b32.xlu1 %v725_v23, %s2165_s15  ;;  %731 = vrot.lane.b32.xlu0 %v725_v23, %s2166_s17  ;;  %v2486_v26 = vpack.c.bf16 %v725_v23, %v725_v23  ;;  %s2717_s17 = sld [smem:[#allocation31_spill]] }
 0x272   : > { %v727_v25 = vpop.f32.mrf.mxu0 }
 0x274   : > { %v1759_v27 = vpop.f32.mrf.mxu0 }
 0x275   : > { %734 = vrot.lane.b32.xlu0 %v725_v23, %s2167_s2  ;;  %745 = vrot.lane.b32.xlu1 %v2486_v26, %s2168_s29 }
 0x2e3   : > { %v738_v28 = vpop.permute.xlu1 %737  ;;  %v732_v29 = vpop.permute.xlu0 %731 }
 0x2e4   : > { %v741_v30 = vpack.c.bf16 %v732_v29, %v732_v29  ;;  %v2489_v33 = vpack.c.bf16 %v738_v28, %v738_v28 }
 0x2e6   : > { %795 = vrot.lane.b32.xlu0 %v741_v30, %s2168_s29 }
 0x2e7   : > { %v735_v31 = vpop.permute.xlu0 %734  ;;  %v746_v32 = vpop.permute.xlu1 %745 }
 0x2e8   : > { %v2491_v34 = vpack.c.bf16 %v735_v31, %v735_v31  ;;  %v752_v35 = vsel %vm747_vm3, %v746_v32, 0 }
 0x2e9   : > { %1761 = vmatpush3.bf16.xpose.msra.mxu1 %v752_v35 }
 0x2ea   : > { %893 = vrot.lane.b32.xlu0 %v2489_v33, %s2168_s29  ;;  %844 = vrot.lane.b32.xlu1 %v2491_v34, %s2168_s29  ;;  %s2173_s29 = smov [#allocation8]  }
 0x2eb   : > { %1772 = vmatprep.subr.bf16.mxu1 %v2163_v17  ;;  %s2058_s11 = sshll.u32 %s2173_s29, 4  ;;  %s2059_s11 = int_to_ptr.vmem [resolvable:$false] %s2058_s11 }
 0x2ec   : > { %p2061_p12 = scmp.lt.s32.totalorder %s2596_s27, %s2059_s11 }
 0x2f0   : > { %1763 = vmatmul.mubr.msk.bf16.vlgmr.msra.gmra.mxu1 %vm747_vm3, %v2486_v26 }
 0x2f1   : > { %1774 = vmatprep.mubr.msk.bf16.mxu1 %vm2164_vm1, %v2163_v17 }
 0x358   : > { %v796_v36 = vpop.permute.xlu0 %795 }
 0x359   : > { %v801_v37 = vsel %vm747_vm3, %v796_v36, 0 }
 0x35a   : > { %1767 = vmatpush3.bf16.xpose.msra.mxu0 %v801_v37 }
 0x35b   : > { %1778 = vmatprep.subr.bf16.mxu0 %v2163_v17 }
 0x35c   : > { %v845_v38 = vpop.permute.xlu1 %844  ;;  %v894_v40 = vpop.permute.xlu0 %893 }
 0x35d   : > { %v850_v39 = vsel %vm747_vm3, %v845_v38, 0  ;;  %v899_v41 = vsel %vm747_vm3, %v894_v40, 0 }
 0x35e   : > { %1773 = vmatpush3.bf16.xpose.msra.mxu1 %v850_v39 }
 0x35f   : > { %1784 = vmatprep.subr.bf16.mxu1 %v2163_v17 }
 0x361   : > { %1769 = vmatmul.mubr.msk.bf16.vlgmr.msra.gmra.mxu0 %vm747_vm3, %v741_v30 }
 0x362   : > { %1779 = vmatpush3.bf16.xpose.msra.mxu0 %v899_v41  ;;  %1780 = vmatprep.mubr.msk.bf16.mxu0 %vm2164_vm1, %v2163_v17 }
 0x363   : > { %1790 = vmatprep.subr.bf16.mxu0 %v2163_v17 }
 0x365   : > { %1775 = vmatmul.mubr.msk.bf16.vlgmr.msra.gmra.mxu1 %vm747_vm3, %v2491_v34 }
 0x366   : > { %1786 = vmatprep.mubr.msk.bf16.mxu1 %vm2164_vm1, %v2163_v17 }
 0x369   : > { %1781 = vmatmul.mubr.msk.bf16.vlgmr.msra.gmra.mxu0 %vm747_vm3, %v2489_v33 }
 0x36a   : > { %1792 = vmatprep.mubr.msk.bf16.mxu0 %vm2164_vm1, %v2163_v17 }
 0x3b0   : > { %v788_v43 = vpop.f32.mrf.mxu1 }
 0x3b1   : > { %v948_v44 = vadd.f32 %v1695_v42, %v788_v43 }
 0x3b2   : > { %v1764_v45 = vpop.f32.mrf.mxu1 }
 0x3b3   : > { %v952_v46 = vsel %vm747_vm3, %v948_v44, -inf }
 0x3b4   : > { %953 = vmax.xlane.f32.xlu1 %v952_v46  ;;  %v791_v47 = vpop.f32.mrf.mxu1 }
 0x3b6   : > { %v1765_v48 = vpop.f32.mrf.mxu1 }
 0x421   : > { %v837_v49 = vpop.f32.mrf.mxu0 }
 0x422   : > { %v949_v50 = vadd.f32 %v1695_v42, %v837_v49 }
 0x423   : > { %v1770_v51 = vpop.f32.mrf.mxu0 }
 0x424   : > { %v955_v52 = vsel %vm747_vm3, %v949_v50, -inf }
 0x425   : > { %v886_v53 = vpop.f32.mrf.mxu1  ;;  %956 = vmax.xlane.f32.xlu0 %v955_v52  ;;  %v840_v54 = vpop.f32.mrf.mxu0  ;;  %v1944_v52 = vld [vmem:[%s2432_s12 + $0x8] sm:$0xff]  }
 0x426   : > { %v950_v55 = vadd.f32 %v1695_v42, %v886_v53  ;;  %v1945_v53 = vld [vmem:[%s2432_s12] sm:$0xff]   ;;  %v1946_v54 = vld [vmem:[%s2441_s25 + $0x8] sm:$0xff]   ;;  %s2172_s12 = smov 24  }
 0x427   : > { %v1771_v56 = vpop.f32.mrf.mxu0  ;;  %v1776_v57 = vpop.f32.mrf.mxu1 }
 0x428   : > { %v958_v58 = vsel %vm747_vm3, %v950_v55, -inf }
 0x429   : > { %v889_v59 = vpop.f32.mrf.mxu1  ;;  %959 = vmax.xlane.f32.xlu0 %v958_v58  ;;  %v935_v60 = vpop.f32.mrf.mxu0 }
 0x42a   : > { %v951_v61 = vadd.f32 %v1695_v42, %v935_v60 }
 0x42b   : > { %v1777_v62 = vpop.f32.mrf.mxu1  ;;  %v1782_v63 = vpop.f32.mrf.mxu0 }
 0x42c   : > { %v961_v0 = vsel %vm747_vm3, %v951_v61, -inf }
 0x42d   : > { %962 = vmax.xlane.f32.xlu1 %v961_v0  ;;  %v938_v1 = vpop.f32.mrf.mxu0 }
 0x42f   : > { %v1783_v2 = vpop.f32.mrf.mxu0 }
 0x43d   : > { %v954_v3 = vpop.xlane.xlu1 %953 }
 0x43e   : > { %1049 = vrot.lane.b32.xlu1 %v741_v30, %s2169_s23  ;;  %v964_v4 = vsub.f32 %v948_v44, %v954_v3 }
 0x43f   : > { %1000 = vrot.lane.b32.xlu0 %v2486_v26, %s2169_s23 }
 0x440   : > { %v968_v5 = vmul.f32 1.442695, %v964_v4 }
 0x442   : > { %1952 = vpow2.f32 %v968_v5 }
 0x44f   : > { %v1953_v6 = vpop.eup %1952 }
 0x450   : > { %v976_v7 = vsel %vm747_vm3, %v1953_v6, 0.0 }
 0x45e   : > { %977 = vadd.xlane.f32.xlu0 %v976_v7 }
 0x4ae   : > { %v957_v8 = vpop.xlane.xlu0 %956 }
 0x4af   : > { %v965_v9 = vsub.f32 %v949_v50, %v957_v8 }
 0x4b1   : > { %v970_v10 = vmul.f32 1.442695, %v965_v9 }
 0x4b2   : > { %v960_v11 = vpop.xlane.xlu0 %959 }
 0x4b3   : > { %1954 = vpow2.f32 %v970_v10  ;;  %v966_v12 = vsub.f32 %v950_v55, %v960_v11  ;;  %v1947_v10 = vld [vmem:[%s2441_s25] sm:$0xff]  }
 0x4b4   : > { %v1700_v11 = vld [vmem:[%s606_s10] ss:$0 sm:$0xff] }
 0x4b5   : > { %v972_v13 = vmul.f32 1.442695, %v966_v12 }
 0x4b6   : > { %v1001_v14 = vpop.permute.xlu0 %1000  ;;  %v963_v15 = vpop.xlane.xlu1 %962 }
 0x4b7   : > { %1956 = vpow2.f32 %v972_v13  ;;  %v1007_v16 = vsel %vm1005_vm4, %v1001_v14, 0  ;;  %v967_v18 = vsub.f32 %v951_v61, %v963_v15 }
 0x4b8   : > { %1785 = vmatpush3.bf16.msra.mxu1 %v1007_v16 }
 0x4b9   : > { %v974_v19 = vmul.f32 1.442695, %v967_v18  ;;  %1796 = vmatprep.subr.bf16.mxu1 %v2163_v17 }
 0x4ba   : > { %v1050_v20 = vpop.permute.xlu1 %1049 }
 0x4bb   : > { %1958 = vpow2.f32 %v974_v19  ;;  %v1055_v21 = vsel %vm1005_vm4, %v1050_v20, 0  ;;  %v1948_v19 = vld [vmem:[%s2451_s18 + $0x18] sm:$0xff]   ;;  %v1949_v20 = vld [vmem:[%s2451_s18 + $0x10] sm:$0xff]  }
 0x4bc   : > { %1791 = vmatpush3.bf16.msra.mxu0 %v1055_v21  ;;  %v1950_v21 = vld [vmem:[%s2451_s18 + $0x8] sm:$0xff]  }
 0x4bd   : > { %1802 = vmatprep.subr.bf16.mxu0 %v2163_v17 }
 0x4c0   : > { %v1955_v22 = vpop.eup %1954 }
 0x4c1   : > { %v979_v23 = vsel %vm747_vm3, %v1955_v22, 0.0 }
 0x4c2   : > { %980 = vadd.xlane.f32.xlu1 %v979_v23  ;;  %v1704_v23 = vld [vmem:[%s614_s13] ss:$0 sm:$0xff]  ;;  %s2714_s13 = sld [smem:[#allocation15_spill]] }
 0x4c4   : > { %v1957_v24 = vpop.eup %1956 }
 0x4c5   : > { %v982_v25 = vsel %vm747_vm3, %v1957_v24, 0.0 }
 0x4c6   : > { %983 = vadd.xlane.f32.xlu0 %v982_v25 }
 0x4c8   : > { %v1959_v26 = vpop.eup %1958  ;;  %s1715_s24 = sshll.u32 %s2714_s13, 7 }
 0x4c9   : > { %v985_v27 = vsel %vm747_vm3, %v1959_v26, 0.0  ;;  %s2594_s2 = scalar_lea.hbm %s2717_s17, %s1715_s24 }
 0x4ca   : > { %986 = vadd.xlane.f32.xlu1 %v985_v27 }
 0x4db   : > { %1097 = vrot.lane.b32.xlu1 %v2491_v34, %s2169_s23 }
 0x4dc   : > { %1145 = vrot.lane.b32.xlu0 %v2489_v33, %s2169_s23  ;;  %s2060_s23 = scalar_lea.vmem %s2059_s11, 256 }
 0x4e7   : > { %v978_v28 = vpop.xlane.xlu0 %977 }
 0x4e8   : > { %1960 = vrcp.f32 %v978_v28 }
 0x4f5   : > { %v1961_v29 = vpop.eup %1960 }
 0x4f6   : > { %v992_v30 = vmul.f32 %v1961_v29, %v1953_v6 }
 0x4f8   : > { %v996_v31 = vpack.c.bf16 %v992_v30, %v992_v30 }
 0x4fa   : > { %1787 = vmatmul.mubr.msk.bf16.vlgmr.msra.gmra.mxu1 %vm747_vm3, %v996_v31 }
 0x4fb   : > { %1798 = vmatprep.mubr.msk.bf16.mxu1 %vm2164_vm1, %v2163_v17 }
 0x54b   : > { %v981_v32 = vpop.xlane.xlu1 %980 }
 0x54c   : > { %1962 = vrcp.f32 %v981_v32 }
 0x54f   : > { %v984_v35 = vpop.xlane.xlu0 %983 }
 0x550   : > { %1964 = vrcp.f32 %v984_v35 }
 0x553   : > { %v987_v36 = vpop.xlane.xlu1 %986  ;;  %v1146_v39 = vpop.permute.xlu0 %1145 }
 0x554   : > { %1966 = vrcp.f32 %v987_v36  ;;  %v1151_v42 = vsel %vm1005_vm4, %v1146_v39, 0 }
 0x557   : > { %v1098_v34 = vpop.permute.xlu1 %1097 }
 0x558   : > { %v1103_v37 = vsel %vm1005_vm4, %v1098_v34, 0 }
 0x559   : > { %v1963_v33 = vpop.eup %1962  ;;  %1797 = vmatpush3.bf16.msra.mxu1 %v1103_v37 }
 0x55a   : > { %v993_v38 = vmul.f32 %v1963_v33, %v1955_v22  ;;  %1808 = vmatprep.subr.bf16.mxu1 %v2163_v17  ;;  %v1951_v22 = vld [vmem:[%s2451_s18] sm:$0xff]  }
 0x55c   : > { %v997_v40 = vpack.c.bf16 %v993_v38, %v993_v38 }
 0x55d   : > { %v1965_v41 = vpop.eup %1964 }
 0x55e   : > { %1793 = vmatmul.mubr.msk.bf16.vlgmr.msra.gmra.mxu0 %vm747_vm3, %v997_v40  ;;  %v994_v43 = vmul.f32 %v1965_v41, %v1957_v24 }
 0x55f   : > { %1803 = vmatpush3.bf16.msra.mxu0 %v1151_v42  ;;  %1804 = vmatprep.mubr.msk.bf16.mxu0 %vm2164_vm1, %v2163_v17 }
 0x560   : > { %v998_v44 = vpack.c.bf16 %v994_v43, %v994_v43  ;;  %1816 = vmatprep.subr.bf16.mxu0 %v2163_v17 }
 0x561   : > { %v1967_v45 = vpop.eup %1966 }
 0x562   : > { %1799 = vmatmul.mubr.msk.bf16.vlgmr.msra.gmra.mxu1 %vm747_vm3, %v998_v44  ;;  %v995_v46 = vmul.f32 %v1967_v45, %v1959_v26 }
 0x563   : > { %1812 = vmatprep.mubr.msk.bf16.mxu1 %vm2164_vm1, %v2163_v17  ;;  %1809 = vmatpush3.bf16.msra.mxu1 %v1944_v52 }
 0x564   : > { %v999_v47 = vpack.c.bf16 %v995_v46, %v995_v46  ;;  %1810 = vmatprep.subr.bf16.mxu1 %v2163_v17 }
 0x566   : > { %1805 = vmatmul.mubr.msk.bf16.vlgmr.msra.gmra.mxu0 %vm747_vm3, %v999_v47 }
 0x567   : > { %1820 = vmatprep.mubr.msk.bf16.mxu0 %vm2164_vm1, %v2163_v17  ;;  %1811 = vmatpush3.bf16.msra.mxu1 %v1945_v53 }
 0x568   : > { %1824 = vmatprep.subr.bf16.mxu1 %v2163_v17  ;;  %1817 = vmatpush3.bf16.msra.mxu0 %v1946_v54  ;;  %v1708_v54 = vld [vmem:[%s622_s20] ss:$0 sm:$0xff]  ;;  %s2054_s20 = scalar_lea.vmem %s2596_s27, 128 }
 0x569   : > { %1818 = vmatprep.subr.bf16.mxu0 %v2163_v17  ;;  %p2055_p2 = scmp.ne.s32.totalorder %s2596_s27, %s2054_s20  ;;  %p2062_p4 = scmp.lt.s32.totalorder %s2060_s23, %s2054_s20 }
 0x56b   : > { %p2056_p8 = pnand %p2055_p2, %p2300_p7  ;;  %p2063_p6 = por %p2062_p4, %p2061_p12 }
 0x56c   : > { %1819 = vmatpush3.bf16.msra.mxu0 %v1947_v10 }
 0x56d   : > { %p2057_p3 = pneg %p2056_p8 }
 0x56f   : > { %p2064_p9 = pnand %p2063_p6, %p2057_p3 }
 0x5ba   : > { %v1043_v48 = vpop.f32.mrf.mxu1 }
 0x5bc   : > { %v1788_v49 = vpop.f32.mrf.mxu1 }
 0x5be   : > { %v1046_v50 = vpop.f32.mrf.mxu1 }
 0x5c0   : > { %v1789_v51 = vpop.f32.mrf.mxu1 }
 0x61e   : > { %v1091_v55 = vpop.f32.mrf.mxu0 }
 0x61f   : > { %1194 = vrot.lane.b32.xlu1 %v1091_v55, %s2170_s14 }
 0x620   : > { %v1794_v56 = vpop.f32.mrf.mxu0 }
 0x622   : > { %v1094_v57 = vpop.f32.mrf.mxu0  ;;  %v1139_v58 = vpop.f32.mrf.mxu1 }
 0x623   : > { %1198 = vrot.lane.b32.xlu0 %v1139_v58, %s2171_s21 }
 0x624   : > { %v1795_v59 = vpop.f32.mrf.mxu0  ;;  %v1800_v60 = vpop.f32.mrf.mxu1 }
 0x626   : > { %v1142_v61 = vpop.f32.mrf.mxu1  ;;  %v1187_v62 = vpop.f32.mrf.mxu0 }
 0x627   : > { %1202 = vrot.lane.b32.xlu1 %v1187_v62, %s2172_s12 }
 0x628   : > { %v1801_v63 = vpop.f32.mrf.mxu1  ;;  %v1806_v0 = vpop.f32.mrf.mxu0 }
 0x62a   : > { %v1190_v1 = vpop.f32.mrf.mxu0 }
 0x62c   : > { %v1807_v2 = vpop.f32.mrf.mxu0 }
 0x691   : > { %v1195_v3 = vpop.permute.xlu1 %1194 }
 0x692   : > { %v1205_v5 = vsel %vm747_vm3, %v1043_v48, %v1195_v3 }
 0x695   : > { %v1199_v4 = vpop.permute.xlu0 %1198 }
 0x696   : > { %v1207_v6 = vsel %vm1206_vm5, %v1205_v5, %v1199_v4 }
 0x699   : > { %v1203_v7 = vpop.permute.xlu1 %1202 }
 0x69a   : > { %v1209_v8 = vsel %vm1208_vm6, %v1207_v6, %v1203_v7 }
 0x69b   : > { %v1210_v9 = vpack.c.bf16 %v1209_v8, %v1209_v8 }
 0x69d   : > { %1813 = vmatmul.mubr.msk.bf16.vlgmr.msra.gmra.mxu1 %vm686_vm2, %v1210_v9 }
 0x69e   : > { %1832 = vmatprep.mubr.msk.bf16.mxu1 %vm2164_vm1, %v2163_v17  ;;  %1825 = vmatpush3.bf16.msra.mxu1 %v1948_v19 }
 0x69f   : > { %1826 = vmatprep.subr.bf16.mxu1 %v2163_v17 }
 0x6a2   : > { %1827 = vmatpush3.bf16.msra.mxu1 %v1949_v20 }
 0x6a3   : > { %1828 = vmatprep.subr.bf16.mxu1 %v2163_v17 }
 0x6a6   : > { %1829 = vmatpush3.bf16.msra.mxu1 %v1950_v21 }
 0x6a7   : > { %1830 = vmatprep.subr.bf16.mxu1 %v2163_v17 }
 0x6aa   : > { %1831 = vmatpush3.bf16.msra.mxu1 %v1951_v22 }
 0x75d   : > { %v1271_v12 = vpop.f32.mrf.mxu1 }
 0x75e   : > { %v1272_v13 = vadd.f32 %v1700_v11, %v1271_v12 }
 0x75f   : > { %v1814_v14 = vpop.f32.mrf.mxu1 }
 0x760   : > { %v1277_v15 = vpack.c.bf16 %v1272_v13, %v1272_v13 }
 0x761   : > { %v1274_v16 = vpop.f32.mrf.mxu1 }
 0x762   : > { %1821 = vmatmul.mubr.msk.bf16.vlgmr.msra.gmra.mxu0 %vm686_vm2, %v1277_v15 }
 0x763   : > { %v1815_v18 = vpop.f32.mrf.mxu1 }
 0x822   : > { %v1338_v24 = vpop.f32.mrf.mxu0 }
 0x823   : > { %v1339_v25 = vadd.f32 %v1704_v23, %v1338_v24 }
 0x824   : > { %v1822_v26 = vpop.f32.mrf.mxu0 }
 0x825   : > { %v1345_v27 = vmul.f32 0.70710677, %v1339_v25  ;;  %v1344_v50 = vmul.f32 0.5, %v1339_v25 }
 0x826   : > { %v1341_v28 = vpop.f32.mrf.mxu0 }
 0x827   : > { %v1346_v29 = vand.u32 2147483647, %v1345_v27  ;;  %vm1366_vm7 = vcmp.lt.f32.partialorder %v1345_v27, 0.0 }
 0x828   : > { %v1823_v30 = vpop.f32.mrf.mxu0 }
 0x829   : > { %v1347_v31 = vmul.f32 0.3275911, %v1346_v29  ;;  %v1360_v35 = vmul.f32 %v1346_v29, %v1346_v29 }
 0x82b   : > { %v1348_v32 = vadd.f32 1.0, %v1347_v31  ;;  %v1361_v36 = vsub.f32 0.0, %v1360_v35 }
 0x82d   : > { %1968 = vrcp.f32 %v1348_v32  ;;  %v1362_v37 = vmul.f32 1.442695, %v1361_v36 }
 0x82f   : > { %1970 = vpow2.f32 %v1362_v37 }
 0x83a   : > { %v1969_v17 = vpop.eup %1968 }
 0x83b   : > { %v1351_v34 = vmul.f32 1.0614054, %v1969_v17 }
 0x83c   : > { %v1971_v45 = vpop.eup %1970 }
 0x83d   : > { %v1352_v33 = vadd.f32 -1.4531521, %v1351_v34 }
 0x83f   : > { %v1353_v38 = vmul.f32 %v1969_v17, %v1352_v33 }
 0x841   : > { %v1354_v39 = vadd.f32 1.4214138, %v1353_v38 }
 0x843   : > { %v1355_v40 = vmul.f32 %v1969_v17, %v1354_v39 }
 0x845   : > { %v1356_v41 = vadd.f32 -0.28449672, %v1355_v40 }
 0x847   : > { %v1357_v42 = vmul.f32 %v1969_v17, %v1356_v41 }
 0x849   : > { %v1358_v43 = vadd.f32 0.2548296, %v1357_v42 }
 0x84b   : > { %v1359_v44 = vmul.f32 %v1969_v17, %v1358_v43 }
 0x84d   : > { %v1364_v46 = vmul.f32 %v1971_v45, %v1359_v44 }
 0x84f   : > { %v1365_v47 = vsub.f32 1.0, %v1364_v46 }
 0x851   : > { %v1367_v48 = vsub.f32 0.0, %v1365_v47 }
 0x853   : > { %v1368_v49 = vsel %vm1366_vm7, %v1367_v48, %v1365_v47 }
 0x854   : > { %v1369_v51 = vadd.f32 1.0, %v1368_v49 }
 0x856   : > { %v1370_v52 = vmul.f32 %v1369_v51, %v1344_v50 }
 0x858   : > { %v1371_v53 = vpack.c.bf16 %v1370_v52, %v1370_v52 }
 0x85a   : > { %1833 = vmatmul.mubr.msk.bf16.vlgmr.msra.gmra.mxu1 %vm1411_vm8, %v1371_v53 }
 0x91a   : > { %v1449_v55 = vpop.f32.mrf.mxu1 }
 0x91b   : > { %v1450_v56 = vadd.f32 %v1708_v54, %v1449_v55 }
 0x91c   : > { %v1834_v57 = vpop.f32.mrf.mxu1 }
 0x91d   : > { %1455 = vst.msk [vmem:[%s2457_s26] sm:$0xff] %vm686_vm2, %v1450_v56 }
 0x91e   : > { %v1452_v58 = vpop.f32.mrf.mxu1 }
 0x91f   : > { %2067 = shalt.err (!%p2064_p9)
}
 0x920   : > { %s2068_s26 = scalar_lea.hbm %s2594_s2, 128  ;;  %s2072_s21 = scalar_lea.hbm %s2717_s17, 256 }
 0x921   : > { %p2069_p11 = scmp.ne.s32.totalorder %s2594_s2, %s2068_s26  ;;  %p2073_p13 = scmp.lt.s32.totalorder %s2594_s2, %s2717_s17 }
 0x922   : > { %p2074_p1 = scmp.lt.s32.totalorder %s2072_s21, %s2068_s26 }
 0x923   : > { %p2070_p0 = pnand %p2069_p11, %p2300_p7 }
 0x924   : > { %p2075_p5 = por %p2074_p1, %p2073_p13 }
 0x925   : > { %p2071_p10 = pneg %p2070_p0 }
 0x927   : > { %p2076_p2 = pnand %p2075_p5, %p2071_p10 }
 0x929   : > { %2079 = shalt.err (!%p2076_p2)
}
 0x92a   : > { %1844 = dma.vmem_to_hbm [thread:$0]  (%p2300_p7), %s2596_s27, 128, %s2594_s2, %s1457_s16   ;;  %v1835_v59 = vpop.f32.mrf.mxu1 }
 0x92b PF: > { %s2718_s30 = sld [smem:[#allocation13_spill]]  ;;  %p1864_p8 = scmp.ge.s32.totalorder %s2158_s28, 2 }
 0x92c   : > { %s2719_s25 = sld [smem:[#allocation19_spill]] }
 0x931   : > { %s1482_s10 = sand.u32 1, %s2718_s30  }
 0x932   : > { %p2720_p3 = scmp.ne.s32.totalorder %s2719_s25, 0  ;;  %s1483_s13 = scalar_lea.sflag [#allocation4], %s1482_s10 }
 0x934   : > { %p1858_p12 = pnand %p1864_p8, %p2720_p3 }
 0x936   : > { %p1859_p4 = pneg %p1858_p12 }
 0x938   : > { %2125 = dma.done.wait (%p1859_p4), %s1483_s13, 128  }
 0x939   : > { %2127 = vsyncadd (%p1859_p4), %s1483_s13, 4294967168  ;;  %s31_s28 = sadd.s32 1, %s2158_s28   ;;  %s2721_s18 = sld [smem:[#allocation14_spill]] }
 0x93a   : > { %p28_p6 = scmp.ge.s32.totalorder %s31_s28, 6   ;;  %s2722_s23 = sld [smem:[#allocation22_spill]] }
 0x93b   : > { %s2723_s24 = sld [smem:[#allocation16_spill]]  ;;  %s2727_s21 = smov %s2134_s22 }
 0x93c   : > { %s2724_s25 = sld [smem:[#allocation17_spill]]  ;;  %30 = sbr.rel (!%p28_p6) target bundleno = 19 (0x13), region = 158 }
 0x93d   : > { %s2725_s26 = sld [smem:[#allocation20_spill]] }
 0x93e   : > { %s2726_s27 = sld [smem:[#allocation21_spill]] }
 0x93f   : > { %s2728_s22 = smov %s2721_s18 }
 0x941   :  { %1488 = vsyncpa [#allocation3], 1 }
 0x942   :  { %1490 = vsyncpa [#allocation3 + $0x1], 1 }
 0x943   :  { %1491 = vsyncpa [#allocation6], 1 }
 0x944   :  { %1493 = vsyncpa [#allocation6 + $0x1], 1 }
 0x945   :  { %1494 = vsyncpa [#allocation4], 1 }
 0x946   :  { %1496 = vsyncpa [#allocation4 + $0x1], 1 }

</bundles_post_ra>
